<compile_context>
chip_gen: v6e
topology: v6e:2x2x1
jax: 0.10.0
libtpu: 0.0.40
codegen_flags: <defaults>
</compile_context>

<pallas_src>
import functools
import math

import jax
import jax.numpy as jnp
import numpy as np
from jax.experimental import pallas as pl
from jax.experimental.pallas import tpu as pltpu


# ---------------------------------------------------------------------------
# Kernel body
# ---------------------------------------------------------------------------
def _angle_resnet_kernel(a_ref, w1_ref, b1_ref, w2_ref, b2_ref, o_ref):
    a0 = a_ref[...]                                            # residual (input dtype)
    x = jnp.maximum(a0, 0)                                     # ReLU
    x = jnp.dot(x, w1_ref[...], preferred_element_type=jnp.float32) + b1_ref[...]
    x = jnp.maximum(x, 0.0)                                    # ReLU (f32)
    x = jnp.dot(x, w2_ref[...], preferred_element_type=jnp.float32) + b2_ref[...]
    o_ref[...] = (x + a0.astype(jnp.float32)).astype(o_ref.dtype)


# ---------------------------------------------------------------------------
# Hardware-aware configuration
# ---------------------------------------------------------------------------
def _tpu_generation():
    try:
        kind = jax.devices()[0].device_kind.lower()
    except Exception:
        return 0
    for g in (7, 6, 5, 4):
        if ("v%d" % g) in kind or ("tpu%d" % g) in kind:
            return g
    return 0


def _hw_config():
    gen = _tpu_generation()
    if gen >= 7:   # v7x: 3.2 TB/s HBM, 64 MiB VMEM, 2 TCs, 256x256 MXU
        return dict(lane_target=256, block_bytes=4 << 20, vmem_limit=40 << 20)
    if gen == 6:   # v6e: 1.4 TB/s HBM, 128 MiB VMEM, 256x256 MXU
        return dict(lane_target=256, block_bytes=4 << 20, vmem_limit=48 << 20)
    if gen == 5:   # v5e: 0.82 TB/s HBM, 16 MiB default scoped VMEM, 4x128x128 MXU
        return dict(lane_target=128, block_bytes=1 << 20, vmem_limit=32 << 20)
    return dict(lane_target=128, block_bytes=1 << 20, vmem_limit=None)


def _pick_pack(c, lane_target):
    """How many C-wide logical rows to pack side-by-side on the lane axis."""
    for lanes in (lane_target, 128):
        if c < lanes and lanes % c == 0:
            return lanes // c
    return 1


def default_pack(c_hidden):
    return _pick_pack(c_hidden, _hw_config()["lane_target"])


def _pick_row_tile(mp, cw, itemsize, block_bytes, vmem_limit):
    """Packed-row tile: large blocks to amortize per-step overhead, bounded by
    the VMEM footprint of the pipelined kernel, >= 4 grid blocks when possible
    (v7x: 2 TensorCores x double-buffering), rounded to the dtype sublane pack."""
    sublane = max(8, 32 // itemsize)          # 8 f32, 16 bf16, 32 int8/fp8
    if mp <= 4 * sublane:
        return mp                              # single block == full extent (allowed)
    cap = block_bytes // (cw * itemsize)
    if vmem_limit is not None:
        # ~2x in-dbuf + 2x out-dbuf (input dtype) + ~4 f32 intermediates per
        # packed row, plus the (cw, cw) weight blocks; keep ~25% headroom.
        per_row = cw * (4 * itemsize + 4 * 4)
        budget = int(vmem_limit * 0.75) - 4 * cw * cw * 4
        cap = min(cap, max(sublane, budget // per_row))
    cap = max(sublane, cap)
    t = min(cap, -(-mp // 4))                  # guarantee >= 4 grid blocks
    return max(sublane, (t // sublane) * sublane)


# ---------------------------------------------------------------------------
# Weight packing (do once per weight set, reuse across forward calls)
# ---------------------------------------------------------------------------
def pack_angle_resnet_params(w1_t, b1, w2_t, b2, *, pack=None, dtype=None):
    """w1_t / w2_t: (C, C) = PyTorch weight transposed (in, out).  Returns the
    grid-invariant kernel operands (w1_k, b1_k, w2_k, b2_k)."""
    c = w1_t.shape[0]
    if pack is None:
        pack = default_pack(c)
    if dtype is None:
        dtype = w1_t.dtype
    cw = pack * c
    if pack > 1:
        eye = jnp.eye(pack, dtype=dtype)
        w1_k = jnp.kron(eye, w1_t.astype(dtype))          # (cw, cw) block-diagonal
        w2_k = jnp.kron(eye, w2_t.astype(dtype))
        b1_k = jnp.tile(b1.astype(jnp.float32), pack).reshape(1, cw)
        b2_k = jnp.tile(b2.astype(jnp.float32), pack).reshape(1, cw)
    else:
        w1_k, w2_k = w1_t.astype(dtype), w2_t.astype(dtype)
        b1_k = b1.astype(jnp.float32).reshape(1, c)
        b2_k = b2.astype(jnp.float32).reshape(1, c)
    return (w1_k, b1_k, w2_k, b2_k)


# ---------------------------------------------------------------------------
# Forward wrappers
# ---------------------------------------------------------------------------
def _plain_forward(x2d, w1_t, b1, w2_t, b2):
    """Plain-XLA path for the tiny (< pack rows) tail; identical math."""
    h = jnp.maximum(x2d, 0)
    h = jnp.dot(h, w1_t, preferred_element_type=jnp.float32) + b1.astype(jnp.float32)
    h = jnp.maximum(h, 0.0)
    h = jnp.dot(h, w2_t, preferred_element_type=jnp.float32) + b2.astype(jnp.float32)
    return (h + x2d.astype(jnp.float32)).astype(x2d.dtype)


def _packed_forward(a2d, packed_ops, pack, c, cfg, donate_input):
    w1_k, b1_k, w2_k, b2_k = packed_ops
    m = a2d.shape[0]
    cw = c * pack
    mp = m // pack
    a_packed = a2d.reshape(mp, cw)            # row-major regrouping of contiguous rows

    itemsize = a2d.dtype.itemsize
    tm = _pick_row_tile(mp, cw, itemsize, cfg["block_bytes"], cfg["vmem_limit"])
    grid = (pl.cdiv(mp, tm),)

    cost = pl.CostEstimate(
        flops=int(4 * m * c * c),
        transcendentals=0,
        bytes_accessed=int(2 * m * c * itemsize
                           + 2 * cw * cw * jnp.dtype(w1_k.dtype).itemsize
                           + 2 * cw * 4),
    )

    out = pl.pallas_call(
        _angle_resnet_kernel,
        out_shape=jax.ShapeDtypeStruct((mp, cw), a2d.dtype),
        grid_spec=pltpu.PrefetchScalarGridSpec(
            num_scalar_prefetch=0,
            grid=grid,
            in_specs=[
                pl.BlockSpec((tm, cw), lambda i: (i, 0)),   # activations, lane-dense
                pl.BlockSpec((cw, cw), lambda i: (0, 0)),   # kron(I, W1^T), grid-invariant
                pl.BlockSpec((1, cw), lambda i: (0, 0)),    # b1 (tiled across lanes)
                pl.BlockSpec((cw, cw), lambda i: (0, 0)),   # kron(I, W2^T), grid-invariant
                pl.BlockSpec((1, cw), lambda i: (0, 0)),    # b2 (tiled across lanes)
            ],
            out_specs=pl.BlockSpec((tm, cw), lambda i: (i, 0)),
        ),
        compiler_params=pltpu.CompilerParams(
            dimension_semantics=("parallel",),
            vmem_limit_bytes=cfg["vmem_limit"],
        ),
        cost_estimate=cost,
        input_output_aliases=({0: 0} if donate_input else {}),
    )(a_packed, w1_k, b1_k, w2_k, b2_k)

    return out.reshape(m, c)


def angle_resnet_block(a, w1_t, b1, w2_t, b2, packed_ops=None, *, donate_input=False):
    """AngleResnetBlock forward.  a: (..., C).  w1_t / w2_t: (C, C) in (in, out)
    layout (PyTorch weight transposed).  b1 / b2: (C,).  packed_ops: optional
    precomputed result of pack_angle_resnet_params (avoids per-call kron)."""
    orig_shape = a.shape
    c = orig_shape[-1]
    a2d = a.reshape(-1, c)
    m = a2d.shape[0]

    cfg = _hw_config()
    if packed_ops is None:
        packed_ops = pack_angle_resnet_params(w1_t, b1, w2_t, b2,
                                              pack=_pick_pack(c, cfg["lane_target"]))
    pack = packed_ops[0].shape[0] // c        # derived from the packed weight (static)

    # No whole-slab pad/slice: packed kernel on the multiple-of-pack prefix,
    # plain XLA on the <= (pack-1)-row tail.
    r = m % pack
    m_main = m - r

    outs = []
    if m_main > 0:
        a_main = a2d if r == 0 else a2d[:m_main]
        outs.append(_packed_forward(a_main, packed_ops, pack, c, cfg, donate_input))
    if r:
        outs.append(_plain_forward(a2d[m_main:], w1_t, b1, w2_t, b2))
    out2d = outs[0] if len(outs) == 1 else jnp.concatenate(outs, axis=0)
    return out2d.reshape(orig_shape)


# ---------------------------------------------------------------------------
# Reference + test
# ---------------------------------------------------------------------------
def _reference(a, w1_t, b1, w2_t, b2):
    s_initial = a
    x = jnp.maximum(a, 0.0)
    x = x @ w1_t + b1
    x = jnp.maximum(x, 0.0)
    x = x @ w2_t + b2
    return x + s_initial


def _trunc_normal(key, shape, scale, fan_in):
    # Truncated normal in [-2, 2] std-units, rescaled like trunc_normal_init_.
    trunc_std = 0.87962566103423978  # std of standard normal truncated to [-2, 2]
    std = math.sqrt(scale / max(1, fan_in)) / trunc_std
    return jax.random.truncated_normal(key, -2.0, 2.0, shape, jnp.float32) * std


if __name__ == "__main__":
    c_hidden = 32
    batch, seq = 2, 8   # M = 16 rows

    key = jax.random.PRNGKey(0)
    k_a, k_w1, k_w2 = jax.random.split(key, 3)

    # Input: (batch, seq, c_hidden)
    a = jax.random.normal(k_a, (batch, seq, c_hidden), jnp.float32)

    # linear_1: init='relu' (He truncated normal), zero bias.
    w1 = _trunc_normal(k_w1, (c_hidden, c_hidden), scale=2.0, fan_in=c_hidden)  # (out, in)
    b1 = jnp.zeros((c_hidden,), jnp.float32)
    # linear_2: init='final' would be all-zeros; use small random weights so the
    # kernel path is numerically exercised (synthetic init for the test only).
    w2 = _trunc_normal(k_w2, (c_hidden, c_hidden), scale=1.0, fan_in=c_hidden)  # (out, in)
    b2 = jnp.zeros((c_hidden,), jnp.float32)

    # Kernel expects (in, out) layout (PyTorch weight transposed).
    w1_t = w1.T
    w2_t = w2.T

    # Pack the weights once (kron / tile), reuse across forward calls.
    packed_ops = pack_angle_resnet_params(w1_t, b1, w2_t, b2)

    ref = _reference(a, w1_t, b1, w2_t, b2)

    fwd = jax.jit(angle_resnet_block)
    out = jax.block_until_ready(fwd(a, w1_t, b1, w2_t, b2, packed_ops))

    np.testing.assert_allclose(np.asarray(out), np.asarray(ref), rtol=5e-5, atol=5e-5)

    print("KERNEL_OK")
</pallas_src>

<mosaic_0001>
module attributes {stable_mosaic.version = 11 : i64} {
  func.func @_angle_resnet_kernel(%arg0: i32, %arg1: memref<4x128xf32, #tpu.memory_space<vmem>>, %arg2: memref<128x128xf32, #tpu.memory_space<vmem>>, %arg3: memref<1x128xf32, #tpu.memory_space<vmem>>, %arg4: memref<128x128xf32, #tpu.memory_space<vmem>>, %arg5: memref<1x128xf32, #tpu.memory_space<vmem>>, %arg6: memref<4x128xf32, #tpu.memory_space<vmem>>) attributes {dimension_semantics = [#tpu.dimension_semantics<parallel>], iteration_bounds = array<i64: 1>, scalar_prefetch = 0 : i64, scratch_operands = 0 : i64, tpu.core_type = #tpu.core_type<tc>, window_params = [{transform_indices = @transform_0, window_bounds = array<i64: 4, 128>}, {pipeline_mode = #tpu.pipeline_mode<synchronous>, transform_indices = @transform_1, window_bounds = array<i64: 128, 128>}, {pipeline_mode = #tpu.pipeline_mode<synchronous>, transform_indices = @transform_2, window_bounds = array<i64: 1, 128>}, {pipeline_mode = #tpu.pipeline_mode<synchronous>, transform_indices = @transform_3, window_bounds = array<i64: 128, 128>}, {pipeline_mode = #tpu.pipeline_mode<synchronous>, transform_indices = @transform_4, window_bounds = array<i64: 1, 128>}, {transform_indices = @transform_5, window_bounds = array<i64: 4, 128>}]} {
    %c0 = arith.constant 0 : index
    %c0_0 = arith.constant 0 : index
    %0 = vector.load %arg1[%c0, %c0_0] : memref<4x128xf32, #tpu.memory_space<vmem>>, vector<4x128xf32>
    %cst = arith.constant 0.000000e+00 : f32
    %1 = vector.broadcast %cst : f32 to vector<4x128xf32>
    %2 = arith.maximumf %0, %1 : vector<4x128xf32>
    %c0_1 = arith.constant 0 : index
    %c0_2 = arith.constant 0 : index
    %3 = vector.load %arg2[%c0_1, %c0_2] : memref<128x128xf32, #tpu.memory_space<vmem>>, vector<128x128xf32>
    %cst_3 = arith.constant dense<0.000000e+00> : vector<4x128xf32>
    %4 = tpu.matmul %2, %3, %cst_3 {dimension_numbers = #tpu.dot_dimension_numbers<[1], [0], [0], [1], [0, 0, 1, 1], [], []>} : vector<4x128xf32>, vector<128x128xf32>, vector<4x128xf32> -> vector<4x128xf32>
    %c0_4 = arith.constant 0 : index
    %c0_5 = arith.constant 0 : index
    %5 = vector.load %arg3[%c0_4, %c0_5] : memref<1x128xf32, #tpu.memory_space<vmem>>, vector<1x128xf32>
    %6 = vector.broadcast %5 : vector<1x128xf32> to vector<4x128xf32>
    %7 = arith.addf %4, %6 : vector<4x128xf32>
    %cst_6 = arith.constant 0.000000e+00 : f32
    %8 = vector.broadcast %cst_6 : f32 to vector<4x128xf32>
    %9 = arith.maximumf %7, %8 : vector<4x128xf32>
    %c0_7 = arith.constant 0 : index
    %c0_8 = arith.constant 0 : index
    %10 = vector.load %arg4[%c0_7, %c0_8] : memref<128x128xf32, #tpu.memory_space<vmem>>, vector<128x128xf32>
    %cst_9 = arith.constant dense<0.000000e+00> : vector<4x128xf32>
    %11 = tpu.matmul %9, %10, %cst_9 {dimension_numbers = #tpu.dot_dimension_numbers<[1], [0], [0], [1], [0, 0, 1, 1], [], []>} : vector<4x128xf32>, vector<128x128xf32>, vector<4x128xf32> -> vector<4x128xf32>
    %c0_10 = arith.constant 0 : index
    %c0_11 = arith.constant 0 : index
    %12 = vector.load %arg5[%c0_10, %c0_11] : memref<1x128xf32, #tpu.memory_space<vmem>>, vector<1x128xf32>
    %13 = vector.broadcast %12 : vector<1x128xf32> to vector<4x128xf32>
    %14 = arith.addf %11, %13 : vector<4x128xf32>
    %15 = arith.addf %14, %0 : vector<4x128xf32>
    %c0_12 = arith.constant 0 : index
    %c0_13 = arith.constant 0 : index
    %16 = vector.load %arg6[%c0_12, %c0_13] : memref<4x128xf32, #tpu.memory_space<vmem>>, vector<4x128xf32>
    tpu.vector_store %arg6[%c0_12, %c0_13], %15 {strides = array<i32>} : memref<4x128xf32, #tpu.memory_space<vmem>>, vector<4x128xf32>,
    return
  }
  func.func @transform_0(%arg0: i32) -> (i32, i32) {
    %c0_i32 = arith.constant 0 : i32
    %c0_i32_0 = arith.constant 0 : i32
    return %arg0, %c0_i32 : i32, i32
  }
  func.func @transform_1(%arg0: i32) -> (i32, i32) {
    %c0_i32 = arith.constant 0 : i32
    %c0_i32_0 = arith.constant 0 : i32
    %c0_i32_1 = arith.constant 0 : i32
    return %c0_i32, %c0_i32_0 : i32, i32
  }
  func.func @transform_2(%arg0: i32) -> (i32, i32) {
    %c0_i32 = arith.constant 0 : i32
    %c0_i32_0 = arith.constant 0 : i32
    %c0_i32_1 = arith.constant 0 : i32
    return %c0_i32, %c0_i32_0 : i32, i32
  }
  func.func @transform_3(%arg0: i32) -> (i32, i32) {
    %c0_i32 = arith.constant 0 : i32
    %c0_i32_0 = arith.constant 0 : i32
    %c0_i32_1 = arith.constant 0 : i32
    return %c0_i32, %c0_i32_0 : i32, i32
  }
  func.func @transform_4(%arg0: i32) -> (i32, i32) {
    %c0_i32 = arith.constant 0 : i32
    %c0_i32_0 = arith.constant 0 : i32
    %c0_i32_1 = arith.constant 0 : i32
    return %c0_i32, %c0_i32_0 : i32, i32
  }
  func.func @transform_5(%arg0: i32) -> (i32, i32) {
    %c0_i32 = arith.constant 0 : i32
    %c0_i32_0 = arith.constant 0 : i32
    return %arg0, %c0_i32 : i32, i32
  }
}

</mosaic_0001>

<bundles_post_ra>
// kernel: angle_resnet_block.1
= control target key start
LH: loop header
LB: loop body
LE: loop exit
PB: predicated region body
PF: predicated region fallthrough
CT: control target
= control target key end

     0   :  { %10 = vsyncpa [#allocation3], 0  ;;  %s489_s0 = inlined_call_operand.vmem [shape: f32[4,128], index: 0, kind: input, shape index: {}]   ;;  %s490_s1 = inlined_call_operand.hbm [shape: f32[128,128], index: 1, kind: input, shape index: {}]   ;;  %s491_s2 = inlined_call_operand.vmem [shape: f32[1,128], index: 2, kind: input, shape index: {}]   ;;  %s492_s3 = inlined_call_operand.hbm [shape: f32[128,128], index: 3, kind: input, shape index: {}]   ;;  %s493_s4 = inlined_call_operand.vmem [shape: f32[1,128], index: 4, kind: input, shape index: {}]   ;;  %s494_s5 = inlined_call_operand.vmem [shape: f32[4,128], index: 5, kind: output, shape index: {}]  }
   0x1   :  { %11 = vsyncpa [#allocation5], 0  ;;  %s401_s18 = smov [#allocation2]  }
   0x2   :  { %s19_s19 = sshll.u32 %s401_s18, 4  ;;  %s20_s19 = int_to_ptr.vmem [resolvable:$true] %s19_s19 }
   0x3   :  { %s365_s20 = scalar_lea.vmem %s20_s19, 2048  ;;  %p370_p1 = scmp.lt.s32.totalorder %s20_s19, %s20_s19 }
   0x4   :  { %p366_p0 = scmp.ne.s32.totalorder %s20_s19, %s365_s20  ;;  %p371_p2 = scmp.lt.s32.totalorder %s365_s20, %s365_s20 }
   0x6   :  { %p372_p3 = por %p371_p2, %p370_p1 }
   0x8   :  { %p373_p4 = pnand %p372_p3, %p366_p0 }
   0xa   :  { %376 = shalt.err (!%p373_p4)
}
   0xb   :  { %s402_s21 = smov 128   ;;  %s403_s22 = smov 8  }
   0xc   :  { %25 = dma.hbm_to_vmem [thread:$0]  %s490_s1, 2048, %s20_s19, [#allocation3], %s402_s21, %s402_s21, %s403_s22  }
   0xd   :  { %s404_s25 = smov [#allocation4]  }
   0xe   :  { %s33_s26 = sshll.u32 %s404_s25, 4  ;;  %s34_s26 = int_to_ptr.vmem [resolvable:$true] %s33_s26 }
   0xf   :  { %s385_s27 = scalar_lea.vmem %s34_s26, 2048  ;;  %p390_p6 = scmp.lt.s32.totalorder %s34_s26, %s34_s26 }
  0x10   :  { %p386_p5 = scmp.ne.s32.totalorder %s34_s26, %s385_s27  ;;  %p391_p7 = scmp.lt.s32.totalorder %s385_s27, %s385_s27 }
  0x12   :  { %p392_p8 = por %p391_p7, %p390_p6 }
  0x14   :  { %p393_p9 = pnand %p392_p8, %p386_p5 }
  0x16   :  { %396 = shalt.err (!%p393_p9)
}
  0x17   :  { %39 = dma.hbm_to_vmem [thread:$0]  %s492_s3, 2048, %s34_s26, [#allocation5], %s402_s21, %s402_s21, %s403_s22  }
  0x18   :  { %397 = dma.done.wait [#allocation3], 2048  }
  0x19   :  { %398 = vsyncadd [#allocation3], 4294965248 }
  0x1a   :  { %399 = dma.done.wait [#allocation5], 2048  }
  0x1b   :  { %400 = vsyncadd [#allocation5], 4294965248  ;;  %v405_v0 = vmov 0.0   ;;  %vm406_vm0 = vmmov 0   ;;  %v65_v1 = vld [vmem:[#allocation2 + $0x78] sm:$0xff]  ;;  %v64_v2 = vld [vmem:[#allocation2 + $0x70] sm:$0xff] }
  0x1c   :  { %281 = vmatprep.subr.mxu0 %v405_v0  ;;  %313 = vmatprep.mubr.msk.f32.mxu0 %vm406_vm0, %v405_v0  ;;  %v63_v3 = vld [vmem:[#allocation2 + $0x68] sm:$0xff]  ;;  %v62_v4 = vld [vmem:[#allocation2 + $0x60] sm:$0xff]  ;;  %v159_v5 = vld [vmem:[#allocation4 + $0x78] sm:$0xff] }
  0x1d   :  { %316 = vmatprep.subr.mxu1 %v405_v0  ;;  %348 = vmatprep.mubr.msk.f32.mxu1 %vm406_vm0, %v405_v0  ;;  %v61_v6 = vld [vmem:[#allocation2 + $0x58] sm:$0xff]  ;;  %v158_v7 = vld [vmem:[#allocation4 + $0x70] sm:$0xff]  ;;  %v157_v8 = vld [vmem:[#allocation4 + $0x68] sm:$0xff] }
  0x1e   :  { %282 = vmatpush3.msra.mxu0 %v65_v1  ;;  %317 = vmatpush3.msra.mxu1 %v159_v5  ;;  %v60_v9 = vld [vmem:[#allocation2 + $0x50] sm:$0xff]  ;;  %v156_v10 = vld [vmem:[#allocation4 + $0x60] sm:$0xff]  ;;  %v59_v11 = vld [vmem:[#allocation2 + $0x48] sm:$0xff] }
  0x1f   :  { %283 = vmatprep.subr.mxu0 %v405_v0  ;;  %318 = vmatprep.subr.mxu1 %v405_v0  ;;  %v155_v12 = vld [vmem:[#allocation4 + $0x58] sm:$0xff]  ;;  %v58_v13 = vld [vmem:[#allocation2 + $0x40] sm:$0xff]  ;;  %v154_v14 = vld [vmem:[#allocation4 + $0x50] sm:$0xff] }
  0x20   :  { %284 = vmatpush3.msra.mxu0 %v64_v2  ;;  %319 = vmatpush3.msra.mxu1 %v158_v7  ;;  %v57_v15 = vld [vmem:[#allocation2 + $0x38] sm:$0xff]  ;;  %v153_v16 = vld [vmem:[#allocation4 + $0x48] sm:$0xff]  ;;  %v56_v17 = vld [vmem:[#allocation2 + $0x30] sm:$0xff] }
  0x21   :  { %285 = vmatprep.subr.mxu0 %v405_v0  ;;  %320 = vmatprep.subr.mxu1 %v405_v0  ;;  %v152_v18 = vld [vmem:[#allocation4 + $0x40] sm:$0xff]  ;;  %v55_v19 = vld [vmem:[#allocation2 + $0x28] sm:$0xff]  ;;  %v151_v20 = vld [vmem:[#allocation4 + $0x38] sm:$0xff] }
  0x22   :  { %286 = vmatpush3.msra.mxu0 %v63_v3  ;;  %321 = vmatpush3.msra.mxu1 %v157_v8  ;;  %v54_v21 = vld [vmem:[#allocation2 + $0x20] sm:$0xff]  ;;  %v150_v22 = vld [vmem:[#allocation4 + $0x30] sm:$0xff]  ;;  %v53_v23 = vld [vmem:[#allocation2 + $0x18] sm:$0xff] }
  0x23   :  { %287 = vmatprep.subr.mxu0 %v405_v0  ;;  %322 = vmatprep.subr.mxu1 %v405_v0  ;;  %v149_v24 = vld [vmem:[#allocation4 + $0x28] sm:$0xff]  ;;  %v52_v25 = vld [vmem:[#allocation2 + $0x10] sm:$0xff]  ;;  %v48_v26 = vld [vmem:[%s489_s0] sm:$0xf] }
  0x24   :  { %288 = vmatpush3.msra.mxu0 %v62_v4  ;;  %323 = vmatpush3.msra.mxu1 %v156_v10  ;;  %v148_v27 = vld [vmem:[#allocation4 + $0x20] sm:$0xff]  ;;  %v51_v28 = vld [vmem:[#allocation2 + $0x8] sm:$0xff]  ;;  %v147_v29 = vld [vmem:[#allocation4 + $0x18] sm:$0xff]  ;;  %v49_v31 = vmax.f32 %v48_v26, 0.0 }
  0x25   :  { %289 = vmatprep.subr.mxu0 %v405_v0  ;;  %324 = vmatprep.subr.mxu1 %v405_v0  ;;  %v50_v30 = vld [vmem:[#allocation2] sm:$0xff]  ;;  %v146_v32 = vld [vmem:[#allocation4 + $0x10] sm:$0xff]  ;;  %v145_v33 = vld [vmem:[#allocation4 + $0x8] sm:$0xff] }
  0x26   :  { %290 = vmatpush3.msra.mxu0 %v61_v6  ;;  %325 = vmatpush3.msra.mxu1 %v155_v12  ;;  %v144_v34 = vld [vmem:[#allocation4] sm:$0xff] }
  0x27   :  { %291 = vmatprep.subr.mxu0 %v405_v0  ;;  %326 = vmatprep.subr.mxu1 %v405_v0  ;;  %v245_v35 = vld [vmem:[%s491_s2] ss:$0 sm:$0xff] }
  0x28   :  { %292 = vmatpush3.msra.mxu0 %v60_v9  ;;  %327 = vmatpush3.msra.mxu1 %v154_v14  ;;  %v246_v40 = vld [vmem:[%s493_s4] ss:$0 sm:$0xff] }
  0x29   :  { %293 = vmatprep.subr.mxu0 %v405_v0  ;;  %328 = vmatprep.subr.mxu1 %v405_v0 }
  0x2a   :  { %294 = vmatpush3.msra.mxu0 %v59_v11  ;;  %329 = vmatpush3.msra.mxu1 %v153_v16 }
  0x2b   :  { %295 = vmatprep.subr.mxu0 %v405_v0  ;;  %330 = vmatprep.subr.mxu1 %v405_v0 }
  0x2c   :  { %296 = vmatpush3.msra.mxu0 %v58_v13  ;;  %331 = vmatpush3.msra.mxu1 %v152_v18 }
  0x2d   :  { %297 = vmatprep.subr.mxu0 %v405_v0  ;;  %332 = vmatprep.subr.mxu1 %v405_v0 }
  0x2e   :  { %298 = vmatpush3.msra.mxu0 %v57_v15  ;;  %333 = vmatpush3.msra.mxu1 %v151_v20 }
  0x2f   :  { %299 = vmatprep.subr.mxu0 %v405_v0  ;;  %334 = vmatprep.subr.mxu1 %v405_v0 }
  0x30   :  { %300 = vmatpush3.msra.mxu0 %v56_v17  ;;  %335 = vmatpush3.msra.mxu1 %v150_v22 }
  0x31   :  { %301 = vmatprep.subr.mxu0 %v405_v0  ;;  %336 = vmatprep.subr.mxu1 %v405_v0 }
  0x32   :  { %302 = vmatpush3.msra.mxu0 %v55_v19  ;;  %337 = vmatpush3.msra.mxu1 %v149_v24 }
  0x33   :  { %303 = vmatprep.subr.mxu0 %v405_v0  ;;  %338 = vmatprep.subr.mxu1 %v405_v0 }
  0x34   :  { %304 = vmatpush3.msra.mxu0 %v54_v21  ;;  %339 = vmatpush3.msra.mxu1 %v148_v27 }
  0x35   :  { %305 = vmatprep.subr.mxu0 %v405_v0  ;;  %340 = vmatprep.subr.mxu1 %v405_v0 }
  0x36   :  { %306 = vmatpush3.msra.mxu0 %v53_v23  ;;  %341 = vmatpush3.msra.mxu1 %v147_v29 }
  0x37   :  { %307 = vmatprep.subr.mxu0 %v405_v0  ;;  %342 = vmatprep.subr.mxu1 %v405_v0 }
  0x38   :  { %308 = vmatpush3.msra.mxu0 %v52_v25  ;;  %343 = vmatpush3.msra.mxu1 %v146_v32 }
  0x39   :  { %309 = vmatprep.subr.mxu0 %v405_v0  ;;  %344 = vmatprep.subr.mxu1 %v405_v0 }
  0x3a   :  { %310 = vmatpush3.msra.mxu0 %v51_v28  ;;  %345 = vmatpush3.msra.mxu1 %v145_v33 }
  0x3b   :  { %311 = vmatprep.subr.mxu0 %v405_v0  ;;  %346 = vmatprep.subr.mxu1 %v405_v0 }
  0x3c   :  { %312 = vmatpush3.msra.mxu0 %v50_v30  ;;  %347 = vmatpush3.msra.mxu1 %v144_v34 }
  0x3d   :  { %314 = vmatmul.mubr.f32.vlgmr.msra.gmra.mxu0 %v49_v31 }
  0xfd   :  { %v139_v36 = vpop.f32.mrf.mxu0 }
  0xfe   :  { %v140_v37 = vadd.f32 %v245_v35, %v139_v36 }
  0xff   :  { %v315_v38 = vpop.f32.mrf.mxu0 }
 0x100   :  { %v143_v39 = vmax.f32 %v140_v37, 0.0 }
 0x102   :  { %349 = vmatmul.mubr.f32.vlgmr.msra.gmra.mxu1 %v143_v39 }
 0x1c2   :  { %v233_v41 = vpop.f32.mrf.mxu1 }
 0x1c3   :  { %v234_v42 = vadd.f32 %v246_v40, %v233_v41 }
 0x1c4   :  { %v350_v43 = vpop.f32.mrf.mxu1 }
 0x1c5   :  { %v237_v44 = vadd.f32 %v234_v42, %v48_v26 }
 0x1c7   :  { %238 = vst [vmem:[%s494_s5] sm:$0xf] %v237_v44 }
 0x1c8   :  { %243 = vsyncpa [#allocation3], 1 }
 0x1c9   :  { %244 = vsyncpa [#allocation5], 1 }

</bundles_post_ra>
